<compile_context>
chip_gen: v7x
topology: tpu7x:2x2x1
jax: 0.10.0
libtpu: 0.0.40
codegen_flags: <defaults>
</compile_context>

<pallas_src>
import functools

import jax
import jax.numpy as jnp
from jax import lax
from jax.experimental import pallas as pl
from jax.experimental.pallas import tpu as pltpu

_LANE = 128


def _round_up(n, m):
    return -(-n // m) * m


def _pad2(a, rows, cols):
    return jnp.pad(a, ((0, rows - a.shape[0]), (0, cols - a.shape[1])))


def _attention_kernel(x_ref, wqkv_ref, bqkv_ref, wp_ref, bp_ref, out_ref,
                      *, seq, c_pad):
    """One batch element per grid step (grid=(B,), parallel).

    x_ref    : (T, Cp)    bf16  token+position embeddings (lane-padded)
    wqkv_ref : (Cp, 3*Cp) bf16  [Wq*scale | Wk | Wv]  (scale pre-folded)
    bqkv_ref : (1, 3*Cp)  f32   [bq*scale | bk | bv]
    wp_ref   : (Cp, Vp)   bf16  output projection (lane-padded vocab)
    bp_ref   : (1, Vp)    f32
    out_ref  : (T, Vp)    f32   logits (lane-dense store)
    """
    x = x_ref[...]                                                 # (T, Cp) bf16

    # Fused QKV projection: bf16 MXU operands, f32 accumulate, f32 bias add.
    qkv = jnp.dot(x, wqkv_ref[...],
                  preferred_element_type=jnp.float32) + bqkv_ref[0]
    q = qkv[:, 0 * c_pad:1 * c_pad]          # static, 128-aligned lane slices
    k = qkv[:, 1 * c_pad:2 * c_pad]
    v = qkv[:, 2 * c_pad:3 * c_pad]

    # Q @ K^T without an explicit transpose: contract last dims directly.
    # 1/sqrt(C) is already folded into Wq/bq.
    s = lax.dot_general(q.astype(jnp.bfloat16), k.astype(jnp.bfloat16),
                        (((1,), (1,)), ((), ())),
                        preferred_element_type=jnp.float32)        # (T, T)

    row = lax.broadcasted_iota(jnp.int32, (seq, seq), 0)
    col = lax.broadcasted_iota(jnp.int32, (seq, seq), 1)
    s = jnp.where(col <= row, s, -jnp.inf)    # diagonal always unmasked -> safe

    # Softmax in f32; reciprocal goes to the EUP slot (free vs VPU divide).
    m = jnp.max(s, axis=-1, keepdims=True)
    e = jnp.exp(s - m)
    inv = pl.reciprocal(jnp.sum(e, axis=-1, keepdims=True), approx=True)
    attn = e * inv

    ctx = jnp.dot(attn.astype(jnp.bfloat16), v.astype(jnp.bfloat16),
                  preferred_element_type=jnp.float32)              # (T, Cp)

    # Output projection to padded vocab: lane-dense unmasked store.
    out_ref[...] = jnp.dot(ctx.astype(jnp.bfloat16), wp_ref[...],
                           preferred_element_type=jnp.float32) + bp_ref[0]


def prepare_params(params):
    """One-time parameter prep (run once at init, NOT per forward):
    fuse Wq/Wk/Wv, fold 1/sqrt(C) into Wq/bq, zero-pad lane dims to 128,
    pad embedding tables, and pre-cast MXU weight operands to bf16."""
    tok = params["token_embedding"]            # (V, C)
    pos = params["position_embedding"]         # (context_window, C)
    C = tok.shape[1]
    V = params["wp"].shape[1]
    Cp = _round_up(C, _LANE)
    Vp = _round_up(V, _LANE)
    scale = 1.0 / (float(C) ** 0.5)

    wqkv = jnp.concatenate([_pad2(params["wq"] * scale, Cp, Cp),
                            _pad2(params["wk"], Cp, Cp),
                            _pad2(params["wv"], Cp, Cp)], axis=1)   # (Cp, 3Cp)
    bqkv = jnp.concatenate([_pad2(params["bq"] * scale, 1, Cp),
                            _pad2(params["bk"], 1, Cp),
                            _pad2(params["bv"], 1, Cp)], axis=1)    # (1, 3Cp)

    return {
        # padded embedding tables: gather output is already (.., Cp) lane-dense
        "tok_emb_p": _pad2(tok, tok.shape[0], Cp).astype(jnp.float32),
        "pos_emb_p": _pad2(pos, pos.shape[0], Cp).astype(jnp.float32),
        "wqkv": wqkv.astype(jnp.bfloat16),
        "bqkv": bqkv.astype(jnp.float32),
        "wp": _pad2(params["wp"], Cp, Vp).astype(jnp.bfloat16),
        "bp": _pad2(params["bp"], 1, Vp).astype(jnp.float32),
        "C": C, "V": V, "Cp": Cp, "Vp": Vp,
    }


def transformer_forward(x_tokens, prep):
    """x_tokens: (B, T) int32 token ids. Returns logits (B, T, V) float32."""
    B, T = x_tokens.shape
    Cp, Vp, V = prep["Cp"], prep["Vp"], prep["V"]

    # Host-side glue: embedding gather lands directly in the padded layout.
    x_emb = jnp.take(prep["tok_emb_p"], x_tokens, axis=0) + prep["pos_emb_p"][:T][None]
    x_bf = x_emb.astype(jnp.bfloat16)                              # (B, T, Cp)

    kernel = functools.partial(_attention_kernel, seq=T, c_pad=Cp)

    flops = 2 * B * T * Cp * (3 * Cp + Vp) + 4 * B * T * T * Cp
    bytes_accessed = (x_bf.size * 2 + prep["wqkv"].size * 2 + prep["bqkv"].size * 4
                      + prep["wp"].size * 2 + prep["bp"].size * 4
                      + B * T * Vp * 4)

    logits_p = pl.pallas_call(
        kernel,
        out_shape=jax.ShapeDtypeStruct((B, T, Vp), jnp.float32),
        grid=(B,),
        in_specs=[
            pl.BlockSpec((None, T, Cp), lambda b: (b, 0, 0)),      # per-batch tile
            pl.BlockSpec((Cp, 3 * Cp), lambda b: (0, 0)),          # weights replicated
            pl.BlockSpec((1, 3 * Cp), lambda b: (0, 0)),
            pl.BlockSpec((Cp, Vp), lambda b: (0, 0)),
            pl.BlockSpec((1, Vp), lambda b: (0, 0)),
        ],
        out_specs=pl.BlockSpec((None, T, Vp), lambda b: (b, 0, 0)),
        compiler_params=pltpu.CompilerParams(
            dimension_semantics=("parallel",)),                    # shard B over v7x TCs
        cost_estimate=pl.CostEstimate(flops=flops,
                                      transcendentals=B * T * (T + 1),
                                      bytes_accessed=bytes_accessed),
    )(x_bf, prep["wqkv"], prep["bqkv"], prep["wp"], prep["bp"])

    return logits_p[..., :V]                                       # (B, T, V)


def _reference_forward(x_tokens, params):
    """Pure-JAX f32 reference matching the PyTorch forward."""
    tok_emb = jnp.take(params["token_embedding"], x_tokens, axis=0)
    T = x_tokens.shape[1]
    x = tok_emb + params["position_embedding"][:T][None]
    q = x @ params["wq"] + params["bq"][0]
    k = x @ params["wk"] + params["bk"][0]
    v = x @ params["wv"] + params["bv"][0]
    s = (q @ jnp.swapaxes(k, -1, -2)) / jnp.sqrt(jnp.float32(k.shape[-1]))
    mask = jnp.tril(jnp.ones((T, T), dtype=bool))
    s = jnp.where(mask[None], s, -jnp.inf)
    w = jax.nn.softmax(s, axis=-1)
    ctx = w @ v
    return ctx @ params["wp"] + params["bp"][0]


def init_params(key, vocab_size, channel_dim, context_window):
    ks = jax.random.split(key, 10)
    C, V = channel_dim, vocab_size
    sc = 0.02
    return {
        "token_embedding": sc * jax.random.normal(ks[0], (V, C), jnp.float32),
        "position_embedding": sc * jax.random.normal(ks[1], (context_window, C), jnp.float32),
        # nn.Linear weight is (out, in); stored here pre-transposed (in, out).
        "wq": sc * jax.random.normal(ks[2], (C, C), jnp.float32),
        "bq": sc * jax.random.normal(ks[3], (1, C), jnp.float32),
        "wk": sc * jax.random.normal(ks[4], (C, C), jnp.float32),
        "bk": sc * jax.random.normal(ks[5], (1, C), jnp.float32),
        "wv": sc * jax.random.normal(ks[6], (C, C), jnp.float32),
        "bv": sc * jax.random.normal(ks[7], (1, C), jnp.float32),
        "wp": sc * jax.random.normal(ks[8], (C, V), jnp.float32),
        "bp": sc * jax.random.normal(ks[9], (1, V), jnp.float32),
    }


if __name__ == "__main__":
    # TODO(synk): cross-entropy loss / generate() multinomial sampling /
    # Adam train loop / checkpointing / plotting are host-side glue and not
    # part of the Pallas hot path; only the forward logits are produced here.
    vocab_size = 32
    channel_dim = 32
    context_window = 8
    B, T = 2, 8

    key = jax.random.PRNGKey(0)
    pkey, xkey = jax.random.split(key)
    params = init_params(pkey, vocab_size, channel_dim, context_window)
    x_tokens = jax.random.randint(xkey, (B, T), 0, vocab_size, dtype=jnp.int32)

    # One-time prep (fusion / padding / bf16 cast) — outside the per-call path.
    prep = jax.tree_util.tree_map(
        lambda a: jax.block_until_ready(a) if isinstance(a, jax.Array) else a,
        prepare_params(params))

    fwd = jax.jit(functools.partial(transformer_forward, prep=prep))
    logits = jax.block_until_ready(fwd(x_tokens))

    ref = _reference_forward(x_tokens, params)
    assert logits.shape == (B, T, vocab_size)
    # Tolerance loosened for bf16 MXU operands + approx EUP reciprocal.
    assert jnp.allclose(logits, ref, atol=2e-3, rtol=2e-3)

    print("KERNEL_OK")
</pallas_src>

<mosaic_0001>
module attributes {stable_mosaic.version = 11 : i64} {
  func.func @_attention_kernel(%arg0: i32, %arg1: memref<1x8x128xbf16, #tpu.memory_space<vmem>>, %arg2: memref<128x384xbf16, #tpu.memory_space<vmem>>, %arg3: memref<1x384xf32, #tpu.memory_space<vmem>>, %arg4: memref<128x128xbf16, #tpu.memory_space<vmem>>, %arg5: memref<1x128xf32, #tpu.memory_space<vmem>>, %arg6: memref<1x8x128xf32, #tpu.memory_space<vmem>>) attributes {dimension_semantics = [#tpu.dimension_semantics<parallel>], iteration_bounds = array<i64: 2>, scalar_prefetch = 0 : i64, scratch_operands = 0 : i64, tpu.core_type = #tpu.core_type<tc>, window_params = [{transform_indices = @transform_0, window_bounds = array<i64: 1, 8, 128>}, {pipeline_mode = #tpu.pipeline_mode<synchronous>, transform_indices = @transform_1, window_bounds = array<i64: 128, 384>}, {pipeline_mode = #tpu.pipeline_mode<synchronous>, transform_indices = @transform_2, window_bounds = array<i64: 1, 384>}, {pipeline_mode = #tpu.pipeline_mode<synchronous>, transform_indices = @transform_3, window_bounds = array<i64: 128, 128>}, {pipeline_mode = #tpu.pipeline_mode<synchronous>, transform_indices = @transform_4, window_bounds = array<i64: 1, 128>}, {transform_indices = @transform_5, window_bounds = array<i64: 1, 8, 128>}]} {
    %c0 = arith.constant 0 : index
    %c0_0 = arith.constant 0 : index
    %c0_1 = arith.constant 0 : index
    %0 = vector.load %arg1[%c0, %c0_0, %c0_1] : memref<1x8x128xbf16, #tpu.memory_space<vmem>>, vector<1x8x128xbf16>
    %1 = vector.shape_cast %0 : vector<1x8x128xbf16> to vector<8x128xbf16>
    %c0_2 = arith.constant 0 : index
    %c0_3 = arith.constant 0 : index
    %2 = vector.load %arg2[%c0_2, %c0_3] : memref<128x384xbf16, #tpu.memory_space<vmem>>, vector<128x384xbf16>
    %cst = arith.constant dense<0.000000e+00> : vector<8x384xf32>
    %3 = tpu.matmul %1, %2, %cst {dimension_numbers = #tpu.dot_dimension_numbers<[1], [0], [0], [1], [0, 0, 1, 1], [], []>} : vector<8x128xbf16>, vector<128x384xbf16>, vector<8x384xf32> -> vector<8x384xf32>
    %c0_4 = arith.constant 0 : index
    %c0_5 = arith.constant 0 : index
    %4 = vector.load %arg3[%c0_4, %c0_5] : memref<1x384xf32, #tpu.memory_space<vmem>>, vector<1x384xf32>
    %5 = vector.shape_cast %4 : vector<1x384xf32> to vector<384xf32>
    %6 = vector.shape_cast %5 : vector<384xf32> to vector<1x384xf32>
    %7 = vector.broadcast %6 : vector<1x384xf32> to vector<8x384xf32>
    %8 = arith.addf %3, %7 : vector<8x384xf32>
    %9 = vector.extract_strided_slice %8 {offsets = [0, 0], sizes = [8, 128], strides = [1, 1]} : vector<8x384xf32> to vector<8x128xf32>
    %10 = vector.extract_strided_slice %8 {offsets = [0, 128], sizes = [8, 128], strides = [1, 1]} : vector<8x384xf32> to vector<8x128xf32>
    %11 = vector.extract_strided_slice %8 {offsets = [0, 256], sizes = [8, 128], strides = [1, 1]} : vector<8x384xf32> to vector<8x128xf32>
    %12 = arith.truncf %9 : vector<8x128xf32> to vector<8x128xbf16>
    %13 = arith.truncf %10 : vector<8x128xf32> to vector<8x128xbf16>
    %cst_6 = arith.constant dense<0.000000e+00> : vector<8x8xf32>
    %14 = tpu.matmul %12, %13, %cst_6 {dimension_numbers = #tpu.dot_dimension_numbers<[1], [1], [0], [0], [0, 0, 1, 0], [], []>} : vector<8x128xbf16>, vector<8x128xbf16>, vector<8x8xf32> -> vector<8x8xf32>
    %15 = tpu.iota {dimensions = array<i32: 0>} : vector<8x8xi32>
    %16 = tpu.iota {dimensions = array<i32: 1>} : vector<8x8xi32>
    %17 = arith.cmpi sle, %16, %15 : vector<8x8xi32>
    %cst_7 = arith.constant 0xFF800000 : f32
    %18 = vector.broadcast %cst_7 : f32 to vector<8x8xf32>
    %19 = arith.select %17, %14, %18 : vector<8x8xi1>, vector<8x8xf32>
    %cst_8 = arith.constant dense<0xFF800000> : vector<8xf32>
    %20 = vector.multi_reduction <maximumf>, %19, %cst_8 [1] : vector<8x8xf32> to vector<8xf32>
    %21 = vector.shape_cast %20 : vector<8xf32> to vector<8x1xf32>
    %22 = vector.broadcast %21 : vector<8x1xf32> to vector<8x8xf32>
    %23 = arith.subf %19, %22 : vector<8x8xf32>
    %24 = math.exp %23 : vector<8x8xf32>
    %cst_9 = arith.constant dense<0.000000e+00> : vector<8xf32>
    %25 = vector.multi_reduction <add>, %24, %cst_9 [1] : vector<8x8xf32> to vector<8xf32>
    %26 = vector.shape_cast %25 : vector<8xf32> to vector<8x1xf32>
    %27 = tpu.reciprocal %26 {approx = true} : vector<8x1xf32> -> vector<8x1xf32>
    %28 = vector.broadcast %27 : vector<8x1xf32> to vector<8x8xf32>
    %29 = arith.mulf %24, %28 : vector<8x8xf32>
    %30 = arith.truncf %29 : vector<8x8xf32> to vector<8x8xbf16>
    %31 = arith.truncf %11 : vector<8x128xf32> to vector<8x128xbf16>
    %cst_10 = arith.constant dense<0.000000e+00> : vector<8x128xf32>
    %32 = tpu.matmul %30, %31, %cst_10 {dimension_numbers = #tpu.dot_dimension_numbers<[1], [0], [0], [1], [0, 0, 1, 1], [], []>} : vector<8x8xbf16>, vector<8x128xbf16>, vector<8x128xf32> -> vector<8x128xf32>
    %33 = arith.truncf %32 : vector<8x128xf32> to vector<8x128xbf16>
    %c0_11 = arith.constant 0 : index
    %c0_12 = arith.constant 0 : index
    %34 = vector.load %arg4[%c0_11, %c0_12] : memref<128x128xbf16, #tpu.memory_space<vmem>>, vector<128x128xbf16>
    %cst_13 = arith.constant dense<0.000000e+00> : vector<8x128xf32>
    %35 = tpu.matmul %33, %34, %cst_13 {dimension_numbers = #tpu.dot_dimension_numbers<[1], [0], [0], [1], [0, 0, 1, 1], [], []>} : vector<8x128xbf16>, vector<128x128xbf16>, vector<8x128xf32> -> vector<8x128xf32>
    %c0_14 = arith.constant 0 : index
    %c0_15 = arith.constant 0 : index
    %36 = vector.load %arg5[%c0_14, %c0_15] : memref<1x128xf32, #tpu.memory_space<vmem>>, vector<1x128xf32>
    %37 = vector.shape_cast %36 : vector<1x128xf32> to vector<128xf32>
    %38 = vector.shape_cast %37 : vector<128xf32> to vector<1x128xf32>
    %39 = vector.broadcast %38 : vector<1x128xf32> to vector<8x128xf32>
    %40 = arith.addf %35, %39 : vector<8x128xf32>
    %c0_16 = arith.constant 0 : index
    %c0_17 = arith.constant 0 : index
    %c0_18 = arith.constant 0 : index
    %41 = vector.load %arg6[%c0_16, %c0_17, %c0_18] : memref<1x8x128xf32, #tpu.memory_space<vmem>>, vector<1x8x128xf32>
    %42 = vector.shape_cast %41 : vector<1x8x128xf32> to vector<8x128xf32>
    %43 = vector.shape_cast %40 : vector<8x128xf32> to vector<1x8x128xf32>
    tpu.vector_store %arg6[%c0_16, %c0_17, %c0_18], %43 {strides = array<i32>} : memref<1x8x128xf32, #tpu.memory_space<vmem>>, vector<1x8x128xf32>,
    return
  }
  func.func @transform_0(%arg0: i32) -> (i32, i32, i32) {
    %c0_i32 = arith.constant 0 : i32
    %c0_i32_0 = arith.constant 0 : i32
    %c0_i32_1 = arith.constant 0 : i32
    return %arg0, %c0_i32, %c0_i32_0 : i32, i32, i32
  }
  func.func @transform_1(%arg0: i32) -> (i32, i32) {
    %c0_i32 = arith.constant 0 : i32
    %c0_i32_0 = arith.constant 0 : i32
    %c0_i32_1 = arith.constant 0 : i32
    return %c0_i32, %c0_i32_0 : i32, i32
  }
  func.func @transform_2(%arg0: i32) -> (i32, i32) {
    %c0_i32 = arith.constant 0 : i32
    %c0_i32_0 = arith.constant 0 : i32
    %c0_i32_1 = arith.constant 0 : i32
    return %c0_i32, %c0_i32_0 : i32, i32
  }
  func.func @transform_3(%arg0: i32) -> (i32, i32) {
    %c0_i32 = arith.constant 0 : i32
    %c0_i32_0 = arith.constant 0 : i32
    %c0_i32_1 = arith.constant 0 : i32
    return %c0_i32, %c0_i32_0 : i32, i32
  }
  func.func @transform_4(%arg0: i32) -> (i32, i32) {
    %c0_i32 = arith.constant 0 : i32
    %c0_i32_0 = arith.constant 0 : i32
    %c0_i32_1 = arith.constant 0 : i32
    return %c0_i32, %c0_i32_0 : i32, i32
  }
  func.func @transform_5(%arg0: i32) -> (i32, i32, i32) {
    %c0_i32 = arith.constant 0 : i32
    %c0_i32_0 = arith.constant 0 : i32
    %c0_i32_1 = arith.constant 0 : i32
    return %arg0, %c0_i32, %c0_i32_0 : i32, i32, i32
  }
}

</mosaic_0001>

<bundles_post_ra>
// kernel: transformer_forward.1
= control target key start
LH: loop header
LB: loop body
LE: loop exit
PB: predicated region body
PF: predicated region fallthrough
CT: control target
= control target key end

     0   :  { %10 = vsyncpa [#allocation3], 0  ;;  %s1308_s0 = inlined_call_operand.vmem [shape: bf16[2,8,128], index: 0, kind: input, shape index: {}]   ;;  %s1309_s1 = inlined_call_operand.vmem [shape: bf16[128,384], index: 1, kind: input, shape index: {}]   ;;  %s1310_s2 = inlined_call_operand.vmem [shape: f32[1,384], index: 2, kind: input, shape index: {}]   ;;  %s1311_s3 = inlined_call_operand.vmem [shape: bf16[128,128], index: 3, kind: input, shape index: {}]   ;;  %s1312_s4 = inlined_call_operand.vmem [shape: f32[1,128], index: 4, kind: input, shape index: {}]   ;;  %s1313_s5 = inlined_call_operand.hbm [shape: f32[2,8,128], index: 5, kind: output, shape index: {}]  }
   0x1   :  { %12 = vsyncpa [#allocation3 + $0x1], 0  ;;  %s1077_s18 = smov 0   ;;  %s1079_s19 = smov 0  }
   0x2   :  { %s1081_s20 = smov 0   ;;  %s1083_s21 = smov 0  }
   0x3 LB: > { %s1098_s22 = sadd.s32 4294967295, %s1041_s21   ;;  %s775_s23 = sadd.s32 4294967294, %s1041_s21   ;;  %s1041_s21 = sphi %s1083_s21, %s1319_s21   ;;  %s1037_s20 = sphi %s1081_s20, %s1318_s20   ;;  %s1033_s19 = sphi %s1079_s19, %s1317_s19   ;;  %s1029_s18 = sphi %s1077_s18, %s1316_s18  }
   0x4   : > { %s1102_s24 = sadd.s32 1, %s1041_s21   ;;  %s135_s25 = sadd.s32 1, %s1037_s20 }
   0x5   : > { %s132_s26 = ssub.s32 %s1041_s21, %s1102_s24  ;;  %p145_p0 = scmp.ne.s32.totalorder %s1037_s20, %s1033_s19 }
   0x6   : > { %p133_p1 = scmp.eq.s32.totalorder %s132_s26, 0  ;;  %p146_p2 = scmp.eq.s32.totalorder %s1098_s22, 1 }
   0x7   : > { %p151_p3 = scmp.ne.s32.totalorder %s1033_s19, %s1029_s18  ;;  %p152_p4 = scmp.eq.s32.totalorder %s775_s23, 1 }
   0x8   : > { %s1113_s27 = scalar_select %p133_p1, %s1037_s20, %s135_s25  }
   0x9   : > { %p1115_p5 = por %p146_p2, %p145_p0  ;;  %p1119_p6 = por %p152_p4, %p151_p3 }
   0xa   : > { %p778_p7 = scmp.ge.s32.totalorder %s1041_s21, 1  ;;  %p189_p8 = scmp.lt.s32.totalorder %s1041_s21, 3 }
   0xc   : > { %p190_p9 = pnand %p778_p7, %p189_p8 }
   0xd   : > { %v935_v0 = vld [vmem:[%s1309_s1 + $0x4] ss:$12 sps:$4 sm:$0xff] (!%p190_p9)   ;;  %v937_v1 = vld [vmem:[%s1309_s1] ss:$12 sps:$4 sm:$0xff] (!%p190_p9)   ;;  %v1043_v2 = vmov (!%p190_p9), 0   ;;  %v1044_v4 = vmov (!%p190_p9), 0.0   ;;  %v256_v27 = vlaneseq (!%p190_p9) }
   0xe   : > { %193 = sbr.rel (%p190_p9) target bundleno = 1241 (0x4d9), region = 40  ;;  %431 = vmatprep.mubr.bf16.mxu0 (!%p190_p9), %v1043_v2  ;;  %399 = vmatprep.subr.bf16.mxu0 (!%p190_p9), %v935_v0  ;;  %v938_v3 = vld [vmem:[%s1309_s1 + $0x1c] ss:$12 sps:$4 sm:$0xff] (!%p190_p9)   ;;  %v940_v5 = vld [vmem:[%s1309_s1 + $0x18] ss:$12 sps:$4 sm:$0xff] (!%p190_p9)   ;;  %p216_p10 = scmp.lt.s32.totalorder (!%p190_p9), %s1098_s22, 1 }
   0xf   : > { %841 = vmatprep.subr.bf16.mxu1 (!%p190_p9), %v1044_v4  ;;  %400 = vmatpush1.bf16.msra.mxu0 (!%p190_p9), %v937_v1  ;;  %v941_v6 = vld [vmem:[%s1309_s1 + $0x34] ss:$12 sps:$4 sm:$0xff] (!%p190_p9)   ;;  %v943_v7 = vld [vmem:[%s1309_s1 + $0x30] ss:$12 sps:$4 sm:$0xff] (!%p190_p9)   ;;  %v944_v8 = vld [vmem:[%s1309_s1 + $0x4c] ss:$12 sps:$4 sm:$0xff] (!%p190_p9)  }
  0x10   : > { %401 = vmatprep.subr.bf16.mxu0 (!%p190_p9), %v938_v3  ;;  %v946_v9 = vld [vmem:[%s1309_s1 + $0x48] ss:$12 sps:$4 sm:$0xff] (!%p190_p9)   ;;  %v947_v11 = vld [vmem:[%s1309_s1 + $0x64] ss:$12 sps:$4 sm:$0xff] (!%p190_p9)   ;;  %v960_v12 = vld [vmem:[%s1309_s1 + $0x20] ss:$12 sps:$4 sm:$0xff] (!%p190_p9)  }
  0x11   : > { %v959_v10 = vld [vmem:[%s1309_s1 + $0x8] ss:$12 sps:$4 sm:$0xff] (!%p190_p9)   ;;  %v949_v13 = vld [vmem:[%s1309_s1 + $0x60] ss:$12 sps:$4 sm:$0xff] (!%p190_p9)   ;;  %v952_v15 = vld [vmem:[%s1309_s1 + $0x78] ss:$12 sps:$4 sm:$0xff] (!%p190_p9)  }
  0x12   : > { %842 = vmatpush3.bf16.msra.mxu1 (!%p190_p9), %v959_v10  ;;  %v950_v14 = vld [vmem:[%s1309_s1 + $0x7c] ss:$12 sps:$4 sm:$0xff] (!%p190_p9)   ;;  %v961_v16 = vld [vmem:[%s1309_s1 + $0x38] ss:$12 sps:$4 sm:$0xff] (!%p190_p9)   ;;  %v953_v17 = vld [vmem:[%s1309_s1 + $0x94] ss:$12 sps:$4 sm:$0xff] (!%p190_p9)  }
  0x13   : > { %402 = vmatpush1.bf16.msra.mxu0 (!%p190_p9), %v940_v5  ;;  %843 = vmatprep.subr.bf16.mxu1 (!%p190_p9), %v1044_v4  ;;  %v962_v18 = vld [vmem:[%s1309_s1 + $0x50] ss:$12 sps:$4 sm:$0xff] (!%p190_p9)   ;;  %v956_v20 = vld [vmem:[%s1309_s1 + $0xac] ss:$12 sps:$4 sm:$0xff] (!%p190_p9)   ;;  %v963_v21 = vld [vmem:[%s1309_s1 + $0x68] ss:$12 sps:$4 sm:$0xff] (!%p190_p9)  }
  0x14   : > { %403 = vmatprep.subr.bf16.mxu0 (!%p190_p9), %v941_v6  ;;  %v955_v19 = vld [vmem:[%s1309_s1 + $0x90] ss:$12 sps:$4 sm:$0xff] (!%p190_p9)   ;;  %v958_v22 = vld [vmem:[%s1309_s1 + $0xa8] ss:$12 sps:$4 sm:$0xff] (!%p190_p9)   ;;  %v964_v23 = vld [vmem:[%s1309_s1 + $0x80] ss:$12 sps:$4 sm:$0xff] (!%p190_p9)  }
  0x15   : > { %s217_s11 = scalar_select %p216_p10, %s1098_s22, 1  ;;  %v965_v25 = vld [vmem:[%s1309_s1 + $0x98] ss:$12 sps:$4 sm:$0xff]   ;;  %v966_v26 = vld [vmem:[%s1309_s1 + $0xb0] ss:$12 sps:$4 sm:$0xff]   ;;  %vm1045_vm0 = vmmov 0  }
  0x16   : > { %844 = vmatpush3.bf16.msra.mxu1 %v960_v12  ;;  %857 = vmatprep.mubr.msk.bf16.mxu1 %vm1045_vm0, %v1044_v4  ;;  %v257_v28 = vshrl.u32 %v256_v27, 7  ;;  %v254_v30 = vld [vmem:[%s1310_s2] sm:$0x7]  ;;  %vm545_vm1 = vcmask 1043456   ;;  %v525_v51 = vand.u32 127, %v256_v27  ;;  %vm528_vm3 = vcmask 64512  }
  0x17   : > { %404 = vmatpush1.bf16.msra.mxu0 %v943_v7  ;;  %845 = vmatprep.subr.bf16.mxu1 %v1044_v4  ;;  %s780_s13 = sshll.u32 %s217_s11, 2  ;;  %v967_v63 = vld [vmem:[%s1311_s3] sm:$0xff]   ;;  %v968_v0 = vld [vmem:[%s1311_s3 + $0x8] sm:$0xff]   ;;  %v969_v1 = vld [vmem:[%s1311_s3 + $0x10] sm:$0xff]   ;;  %s816_s17 = sshll.u32 %s1098_s22, 7 }
  0x18   : > { %405 = vmatprep.subr.bf16.mxu0 %v944_v8  ;;  %s219_s26 = scalar_lea.vmem %s1308_s0, %s780_s13  ;;  %v262_v29 = vsub.s32 1, %v257_v28  ;;  %v258_v32 = vsub.s32 0, %v257_v28  ;;  %v266_v42 = vsub.s32 2, %v257_v28  ;;  %vm526_vm2 = vcmp.le.s32.totalorder %v525_v51, %v257_v28  ;;  %v970_v2 = vld [vmem:[%s1311_s3 + $0x18] sm:$0xff]   ;;  %v971_v3 = vld [vmem:[%s1311_s3 + $0x20] sm:$0xff]   ;;  %v972_v5 = vld [vmem:[%s1311_s3 + $0x28] sm:$0xff]   ;;  %s1266_s11 = scalar_lea.hbm %s1313_s5, %s816_s17 }
  0x19   : > { %v221_v24 = vld [vmem:[%s219_s26] sm:$0xf]  ;;  %v973_v6 = vld [vmem:[%s1311_s3 + $0x30] sm:$0xff]   ;;  %s213_s13 = sand.u32 1, %s1033_s19   ;;  %s1046_s7 = smov [#allocation2]  }
  0x1a   : > { %846 = vmatpush3.bf16.msra.mxu1 %v961_v16  ;;  %v263_v31 = vrot.slane %v254_v30, %v262_v29  ;;  %v259_v37 = vrot.slane %v254_v30, %v258_v32  ;;  %v267_v43 = vrot.slane %v254_v30, %v266_v42  ;;  %s779_s14 = sshll.u32 %s213_s13, 3  ;;  %s703_s6 = scalar_lea.sflag [#allocation3], %s213_s13 }
  0x1b   : > { %406 = vmatpush1.bf16.msra.mxu0 %v946_v9  ;;  %847 = vmatprep.subr.bf16.mxu1 %v1044_v4  ;;  %s215_s23 = scalar_lea.vmem [#allocation2], %s779_s14  ;;  %s983_s8 = sshll.u32 %s1046_s7, 4  ;;  %s984_s8 = int_to_ptr.vmem [resolvable:$false] %s983_s8 }
  0x1c   : > { %407 = vmatprep.subr.bf16.mxu0 %v947_v11  ;;  %v974_v11 = vld [vmem:[%s1311_s3 + $0x38] sm:$0xff]   ;;  %s716_s25 = sshll.u32 %s215_s23, 4  ;;  %s985_s9 = scalar_lea.vmem %s984_s8, 256  ;;  %s1268_s25 = int_to_ptr.vmem [resolvable:$true] %s716_s25 }
  0x1d   : > { %s979_s22 = scalar_lea.vmem %s1268_s25, 128  ;;  %p986_p0 = scmp.lt.s32.totalorder %s1268_s25, %s984_s8 }
  0x1e   : > { %848 = vmatpush3.bf16.msra.mxu1 %v962_v18  ;;  %p980_p11 = scmp.ne.s32.totalorder %s1268_s25, %s979_s22  ;;  %p987_p1 = scmp.lt.s32.totalorder %s985_s9, %s979_s22 }
  0x1f   : > { %408 = vmatpush1.bf16.msra.mxu0 %v949_v13  ;;  %849 = vmatprep.subr.bf16.mxu1 %v1044_v4 }
  0x20   : > { %409 = vmatprep.subr.bf16.mxu0 %v950_v14  ;;  %p981_p12 = pnand %p980_p11, %p1115_p5  ;;  %p988_p2 = por %p987_p1, %p986_p0 }
  0x22   : > { %850 = vmatpush3.bf16.msra.mxu1 %v963_v21  ;;  %p982_p13 = pneg %p981_p12 }
  0x23   : > { %410 = vmatpush1.bf16.msra.mxu0 %v952_v15  ;;  %851 = vmatprep.subr.bf16.mxu1 %v1044_v4 }
  0x24   : > { %411 = vmatprep.subr.bf16.mxu0 %v953_v17  ;;  %p989_p3 = pnand %p988_p2, %p982_p13 }
  0x26   : > { %852 = vmatpush3.bf16.msra.mxu1 %v964_v23 }
  0x27   : > { %412 = vmatpush1.bf16.msra.mxu0 %v955_v19  ;;  %853 = vmatprep.subr.bf16.mxu1 %v1044_v4 }
  0x28   : > { %413 = vmatprep.subr.bf16.mxu0 %v956_v20 }
  0x2a   : > { %854 = vmatpush3.bf16.msra.mxu1 %v965_v25 }
  0x2b   : > { %414 = vmatpush1.bf16.msra.mxu0 %v958_v22  ;;  %855 = vmatprep.subr.bf16.mxu1 %v1044_v4 }
  0x2c   : > { %873 = vmatprep.subr.bf16.mxu0 %v1044_v4 }
  0x2e   : > { %432 = vmatmul.mubr.bf16.vlgmr.msra.gmra.mrb[0].mxu0 %v221_v24  ;;  %856 = vmatpush3.bf16.msra.mxu1 %v966_v26 }
  0x2f   : > { %861 = vmatprep.subr.bf16.mxu1 %v1044_v4  ;;  %889 = vmatprep.mubr.msk.bf16.mxu0 %vm1045_vm0, %v1044_v4 }
  0x30   : > { %874 = vmatpush3.bf16.msra.mxu0 %v967_v63 }
  0x31   : > { %858 = vmatmul.mubr.bf16.vlgmr.msra.gmra.mrb[0].mxu1 %v221_v24  ;;  %875 = vmatprep.subr.bf16.mxu0 %v1044_v4 }
  0x32   : > { %863 = vmatprep.mubr.msk.bf16.mxu1 %vm1045_vm0, %v1044_v4 }
  0x34   : > { %876 = vmatpush3.bf16.msra.mxu0 %v968_v0 }
  0x35   : > { %877 = vmatprep.subr.bf16.mxu0 %v1044_v4 }
  0x38   : > { %878 = vmatpush3.bf16.msra.mxu0 %v969_v1 }
  0x39   : > { %879 = vmatprep.subr.bf16.mxu0 %v1044_v4 }
  0x3c   : > { %880 = vmatpush3.bf16.msra.mxu0 %v970_v2 }
  0x3d   : > { %881 = vmatprep.subr.bf16.mxu0 %v1044_v4 }
  0x40   : > { %882 = vmatpush3.bf16.msra.mxu0 %v971_v3 }
  0x41   : > { %883 = vmatprep.subr.bf16.mxu0 %v1044_v4 }
  0x44   : > { %884 = vmatpush3.bf16.msra.mxu0 %v972_v5 }
  0x45   : > { %885 = vmatprep.subr.bf16.mxu0 %v1044_v4 }
  0x48   : > { %886 = vmatpush3.bf16.msra.mxu0 %v973_v6 }
  0x49   : > { %887 = vmatprep.subr.bf16.mxu0 %v1044_v4 }
  0x4c   : > { %888 = vmatpush3.bf16.msra.mxu0 %v974_v11 }
 0x101   : > { %v433_v33 = vpop.f32.mrb[0].mxu0 }
 0x102   : > { %v435_v34 = vpop.f32.mrb[1].mxu0  ;;  %v434_v40 = vadd.f32 %v433_v33, %v259_v37 }
 0x103   : > { %v436_v35 = vadd.f32 %v435_v34, %v263_v31  ;;  %v437_v36 = vpop.f32.mrb[2].mxu0 }
 0x104   : > { %v438_v38 = vpop.f32.mrb[3].mxu0  ;;  %v480_v41 = vpack.c.bf16 %v434_v40, %v434_v40  ;;  %v474_v44 = vpop.f32.mrb[0].mxu1 }
 0x105   : > { %v481_v39 = vpack.c.bf16 %v436_v35, %v436_v35  ;;  %v475_v45 = vadd.f32 %v474_v44, %v267_v43  ;;  %v859_v46 = vpop.f32.mrb[1].mxu1 }
 0x106   : > { %v477_v47 = vpop.f32.mrb[2].mxu1 }
 0x107   : > { %862 = vmatpush3.bf16.xpose.msra.mxu1 %v481_v39  ;;  %v541_v48 = vpack.c.bf16 %v475_v45, %v475_v45  ;;  %v860_v49 = vpop.f32.mrb[3].mxu1 }
 0x108   : > { %867 = vmatprep.subr.bf16.mxu1 %v1044_v4 }
 0x109   : > { %v547_v50 = vsel %vm545_vm1, %v541_v48, 0 }
 0x10e   : > { %864 = vmatmul.mubr.bf16.vlgmr.msra.gmra.mrb[4].mxu1 %v480_v41 }
 0x10f   : > { %869 = vmatprep.mubr.msk.bf16.mxu1 %vm1045_vm0, %v1044_v4  ;;  %868 = vmatpush3.bf16.msra.mxu1 %v547_v50  ;;  %v806_v4 = vld [vmem:[%s1312_s4] ss:$0 sm:$0xff] }
 0x1e1   : > { %v516_v52 = vpop.f32.mrb[4].mxu1 }
 0x1e2   : > { %v527_v53 = vsel %vm526_vm2, %v516_v52, -inf  ;;  %v865_v54 = vpop.f32.mrb[5].mxu1 }
 0x1e3   : > { %v519_v55 = vpop.f32.mrb[6].mxu1  ;;  %v529_v56 = vsel %vm528_vm3, %v527_v53, -inf }
 0x1e4   : > { %530 = vmax.xlane.f32.xlu0 %v529_v56  ;;  %v866_v57 = vpop.f32.mrb[7].mxu1 }
 0x271   : > { %v531_v58 = vpop.xlane.xlu0 %530 }
 0x272   : > { %v532_v59 = vsub.f32 %v527_v53, %v531_v58 }
 0x274   : > { %v533_v60 = vmul.f32 1.442695, %v532_v59 }
 0x276   : > { %975 = vpow2.f32 %v533_v60 }
 0x280   : > { %v976_v61 = vpop.eup %975 }
 0x281   : > { %v535_v62 = vsel %vm528_vm3, %v976_v61, 0.0 }
 0x282   : > { %536 = vadd.xlane.f32.xlu0 %v535_v62 }
 0x30f   : > { %v537_v7 = vpop.xlane.xlu0 %536 }
 0x310   : > { %977 = vrcp.f32 %v537_v7 }
 0x31a   : > { %v978_v8 = vpop.eup %977 }
 0x31b   : > { %v539_v9 = vmul.f32 %v978_v8, %v976_v61 }
 0x31d   : > { %v540_v10 = vpack.c.bf16 %v539_v9, %v539_v9 }
 0x31f   : > { %870 = vmatmul.mubr.msk.bf16.vlgmr.msra.gmra.mrb[8].mxu1 %vm528_vm3, %v540_v10 }
 0x3f2   : > { %v583_v12 = vpop.f32.mrb[8].mxu1 }
 0x3f3   : > { %v589_v13 = vpack.c.bf16 %v583_v12, %v583_v12  ;;  %v871_v14 = vpop.f32.mrb[9].mxu1 }
 0x3f4   : > { %v586_v15 = vpop.f32.mrb[10].mxu1 }
 0x3f5   : > { %v872_v16 = vpop.f32.mrb[11].mxu1  ;;  %890 = vmatmul.mubr.bf16.vlgmr.msra.gmra.mrb[4].mxu0 %v589_v13 }
 0x4c8   : > { %v695_v17 = vpop.f32.mrb[4].mxu0 }
 0x4c9   : > { %v696_v18 = vadd.f32 %v806_v4, %v695_v17  ;;  %v891_v19 = vpop.f32.mrb[5].mxu0 }
 0x4ca   : > { %v698_v20 = vpop.f32.mrb[6].mxu0 }
 0x4cb   : > { %701 = vst [vmem:[%s215_s23] sm:$0xff] %v696_v18  ;;  %v892_v21 = vpop.f32.mrb[7].mxu0 }
 0x4cc   : > { %992 = shalt.err (!%p989_p3)
}
 0x4cd   : > { %s993_s10 = scalar_lea.hbm %s1266_s11, 128  ;;  %s997_s14 = scalar_lea.hbm %s1313_s5, 256 }
 0x4ce   : > { %p994_p4 = scmp.ne.s32.totalorder %s1266_s11, %s993_s10  ;;  %p998_p9 = scmp.lt.u32.totalorder %s1266_s11, %s1313_s5 }
 0x4cf   : > { %p999_p10 = scmp.lt.u32.totalorder %s997_s14, %s993_s10  ;;  %p1001_p12 = scmp.lt.u32.totalorder %s993_s10, %s1266_s11 }
 0x4d0   : > { %p995_p7 = pnand %p994_p4, %p1115_p5 }
 0x4d1   : > { %p1000_p11 = por %p999_p10, %p998_p9 }
 0x4d2   : > { %p996_p8 = pneg %p995_p7 }
 0x4d3   : > { %p1002_p13 = por %p1001_p12, %p1000_p11 }
 0x4d5   : > { %p1003_p0 = pnand %p1002_p13, %p996_p8 }
 0x4d7   : > { %1006 = shalt.err (!%p1003_p0)
}
 0x4d8   : > { %893 = dma.vmem_to_hbm [thread:$0]  (%p1115_p5), %s1268_s25, 128, %s1266_s11, %s703_s6  }
 0x4d9 PF: > { %p899_p1 = scmp.ge.s32.totalorder %s1041_s21, 2  ;;  %s728_s17 = sand.u32 1, %s1029_s18  }
 0x4da   : > { %s729_s23 = scalar_lea.sflag [#allocation3], %s728_s17 }
 0x4db   : > { %p896_p2 = pnand %p899_p1, %p1119_p6 }
 0x4dd   : > { %1024 = dma.done.wait (!%p896_p2), %s729_s23, 128  }
 0x4de   : > { %1026 = vsyncadd (!%p896_p2), %s729_s23, 4294967168  ;;  %p15_p3 = scmp.ge.s32.totalorder %s1102_s24, 4   ;;  %s1316_s18 = smov %s1033_s19 }
 0x4df   : > { %s1317_s19 = smov %s1037_s20  ;;  %s1318_s20 = smov %s1113_s27 }
 0x4e0   : > { %s1319_s21 = smov %s1102_s24  ;;  %17 = sbr.rel (!%p15_p3) target bundleno = 3 (0x3), region = 75 }
 0x4e7   :  { %734 = vsyncpa [#allocation3], 1 }
 0x4e8   :  { %736 = vsyncpa [#allocation3 + $0x1], 1 }

</bundles_post_ra>
